<compile_context>
chip_gen: v6e
topology: v6e:2x2x1
jax: 0.10.0
libtpu: 0.0.40
codegen_flags: <defaults>
</compile_context>

<pallas_src>
import functools

import jax
import jax.numpy as jnp
from jax.experimental import pallas as pl
from jax.experimental.pallas import tpu as pltpu

BN_EPS = 1e-3
NEG_BIG = -1e30   # bias sentinel for padded softmax (px_scale) columns
POS_BIG = 1e30    # bias sentinel for padded mixing columns (-> 1 - sigmoid == 0)


def _round_up(x, m):
    return ((x + m - 1) // m) * m


# ---------------------------------------------------------------------------
# Kernel 1 (gridless prologue): the four hidden FCLayers blocks, fused.
#   hid = relu(BatchNorm1d(z @ Wh + bh))  with Wh packed as (D, 4H):
#   [px_decoder | py_back_decoder | py_fore_decoder | sigmoid_decoder]
# ---------------------------------------------------------------------------
def hidden_kernel(z_ref, Wh_ref, bh_ref, gh_ref, beh_ref, hid_ref):
    z = z_ref[...].astype(jnp.bfloat16)
    h = jnp.dot(z, Wh_ref[...], preferred_element_type=jnp.float32) + bh_ref[...]
    mu = jnp.mean(h, axis=0, keepdims=True)
    d = h - mu
    var = jnp.mean(d * d, axis=0, keepdims=True)      # two-pass, biased (torch BN train)
    hn = d * jax.lax.rsqrt(var + BN_EPS)
    hid_ref[...] = jnp.maximum(hn * gh_ref[...] + beh_ref[...], 0.0)


# ---------------------------------------------------------------------------
# Kernel 2 (B-tiled, row-parallel): all six output heads.
# Ng / Np below are the PADDED widths (multiples of 128).
# ---------------------------------------------------------------------------
def make_heads_kernel(H, Ng, Np):
    def kernel(hid_ref, z_ref, lib_ref, eps_ref,
               Wz_ref, bz_ref, Wg_ref, Wp_ab_ref, Wp_fore_ref, W_mix_ref,
               gene_ref, prot_ref):
        zb = z_ref[...].astype(jnp.bfloat16)
        lib = lib_ref[...]
        eps = eps_ref[...]

        h_px = hid_ref[:, 0 * H:1 * H].astype(jnp.bfloat16)
        h_back = hid_ref[:, 1 * H:2 * H].astype(jnp.bfloat16)
        h_fore = hid_ref[:, 2 * H:3 * H].astype(jnp.bfloat16)
        h_mix = hid_ref[:, 3 * H:4 * H].astype(jnp.bfloat16)

        # z-contribution of all six heads + all head biases in one matmul.
        # columns: [scale Ng | dropout Ng | alpha Np | beta Np | fore Np | mix Np]
        zc = jnp.dot(zb, Wz_ref[...], preferred_element_type=jnp.float32) + bz_ref[...]

        # ---- genes: px_scale (softmax) and px_rate -----------------------------
        u = jnp.dot(h_px, Wg_ref[...], preferred_element_type=jnp.float32) + zc[:, 0:Ng]
        u = u - jnp.max(u, axis=-1, keepdims=True)
        e = jnp.exp(u)
        px_scale = e / jnp.sum(e, axis=-1, keepdims=True)          # exact division
        gene_ref[:, 0:Ng] = px_scale
        gene_ref[:, Ng:2 * Ng] = lib * px_scale                    # px_rate

        # ---- protein background ------------------------------------------------
        ab = (jnp.dot(h_back, Wp_ab_ref[...], preferred_element_type=jnp.float32)
              + zc[:, 2 * Ng:2 * Ng + 2 * Np])
        back_alpha = ab[:, 0:Np]
        back_beta = jnp.exp(ab[:, Np:2 * Np])
        prot_ref[:, 0:Np] = back_alpha
        prot_ref[:, Np:2 * Np] = back_beta
        log_back = back_alpha + back_beta * eps                    # Normal(a,b).rsample()
        rate_back = jnp.exp(log_back)
        prot_ref[:, 2 * Np:3 * Np] = log_back
        prot_ref[:, 3 * Np:4 * Np] = rate_back

        # ---- protein foreground ------------------------------------------------
        f = (jnp.dot(h_fore, Wp_fore_ref[...], preferred_element_type=jnp.float32)
             + zc[:, 2 * Ng + 2 * Np:2 * Ng + 3 * Np])
        fore_scale = jnp.maximum(f, 0.0) + (1.0 + 1e-8)
        rate_fore = rate_back * fore_scale
        prot_ref[:, 4 * Np:5 * Np] = fore_scale
        prot_ref[:, 5 * Np:6 * Np] = rate_fore

        # ---- gene dropout + protein mixing (shared h_mix matmul) ---------------
        dm = jnp.dot(h_mix, W_mix_ref[...], preferred_element_type=jnp.float32)
        gene_ref[:, 2 * Ng:3 * Ng] = dm[:, 0:Ng] + zc[:, Ng:2 * Ng]        # px_dropout
        mixing = dm[:, Ng:Ng + Np] + zc[:, 2 * Ng + 3 * Np:2 * Ng + 4 * Np]
        prot_ref[:, 6 * Np:7 * Np] = mixing

        protein_mixing = 1.0 / (1.0 + jnp.exp(-mixing))            # exact sigmoid
        s = (1.0 - protein_mixing) * rate_fore
        denom = jnp.maximum(jnp.sum(jnp.abs(s), axis=-1, keepdims=True), 1e-12)
        prot_ref[:, 7 * Np:8 * Np] = s / denom                     # py_scale (L1)

    return kernel


# ---------------------------------------------------------------------------
# Parameter construction / packing.
# ---------------------------------------------------------------------------
def init_raw_params(key, n_input, n_hidden, n_genes, n_proteins):
    """Torch-like parameters (one entry per sub-module of DecoderTOTALVI)."""
    D, H, Ng, Np = n_input, n_hidden, n_genes, n_proteins
    ks = iter(jax.random.split(key, 32))
    f32 = jnp.float32

    def hidden_dec():
        return {"W": 0.1 * jax.random.normal(next(ks), (D, H), f32),
                "b": 0.1 * jax.random.normal(next(ks), (H,), f32),
                "gamma": 1.0 + 0.1 * jax.random.normal(next(ks), (H,), f32),
                "beta": 0.1 * jax.random.normal(next(ks), (H,), f32)}

    def linear(n_out):
        return {"W": 0.1 * jax.random.normal(next(ks), (H + D, n_out), f32),
                "b": 0.1 * jax.random.normal(next(ks), (n_out,), f32)}

    return {"px_dec": hidden_dec(), "back_dec": hidden_dec(),
            "fore_dec": hidden_dec(), "mix_dec": hidden_dec(),
            "px_scale": linear(Ng), "px_dropout": linear(Ng),
            "back_alpha": linear(Np), "back_beta": linear(Np),
            "fore_scale": linear(Np), "mixing": linear(Np)}


def pack_params(raw, n_genes, n_proteins):
    """Pack into lane-aligned bf16 slabs (Ng/Np padded to multiples of 128)."""
    H = raw["px_dec"]["W"].shape[1]
    Ng, Np = n_genes, n_proteins
    Ng_p, Np_p = _round_up(Ng, 128), _round_up(Np, 128)
    bf16, f32 = jnp.bfloat16, jnp.float32

    def padw(W, n):
        return jnp.pad(W, ((0, 0), (0, n - W.shape[1])))

    def padb(b, n, fill=0.0):
        return jnp.pad(b.reshape(1, -1).astype(f32),
                       ((0, 0), (0, n - b.shape[-1])), constant_values=fill)

    hid_keys = ("px_dec", "back_dec", "fore_dec", "mix_dec")
    Wh = jnp.concatenate([raw[k]["W"] for k in hid_keys], axis=1)
    bh = jnp.concatenate([raw[k]["b"] for k in hid_keys]).reshape(1, -1)
    gh = jnp.concatenate([raw[k]["gamma"] for k in hid_keys]).reshape(1, -1)
    beh = jnp.concatenate([raw[k]["beta"] for k in hid_keys]).reshape(1, -1)

    def split(lin):           # cat([h, z]) @ W  ==  h @ W[:H] + z @ W[H:]
        return lin["W"][:H], lin["W"][H:]

    Ws_h, Ws_z = split(raw["px_scale"])
    Wd_h, Wd_z = split(raw["px_dropout"])
    Wa_h, Wa_z = split(raw["back_alpha"])
    Wb_h, Wb_z = split(raw["back_beta"])
    Wf_h, Wf_z = split(raw["fore_scale"])
    Wm_h, Wm_z = split(raw["mixing"])

    Wz = jnp.concatenate([padw(Ws_z, Ng_p), padw(Wd_z, Ng_p),
                          padw(Wa_z, Np_p), padw(Wb_z, Np_p),
                          padw(Wf_z, Np_p), padw(Wm_z, Np_p)], axis=1)
    # Padded softmax cols: bias -1e30 -> exp == 0.  Padded mixing cols: +1e30 ->
    # 1 - sigmoid == 0, so the L1 normalize ignores them exactly.
    bz = jnp.concatenate([padb(raw["px_scale"]["b"], Ng_p, NEG_BIG),
                          padb(raw["px_dropout"]["b"], Ng_p),
                          padb(raw["back_alpha"]["b"], Np_p),
                          padb(raw["back_beta"]["b"], Np_p),
                          padb(raw["fore_scale"]["b"], Np_p),
                          padb(raw["mixing"]["b"], Np_p, POS_BIG)], axis=1)

    return {"Wh": Wh.astype(bf16), "bh": bh.astype(f32),
            "gh": gh.astype(f32), "beh": beh.astype(f32),
            "Wz": Wz.astype(bf16), "bz": bz.astype(f32),
            "Wg": padw(Ws_h, Ng_p).astype(bf16),
            "Wp_ab": jnp.concatenate([padw(Wa_h, Np_p), padw(Wb_h, Np_p)], 1).astype(bf16),
            "Wp_fore": padw(Wf_h, Np_p).astype(bf16),
            "W_mix": jnp.concatenate([padw(Wd_h, Ng_p), padw(Wm_h, Np_p)], 1).astype(bf16)}


# ---------------------------------------------------------------------------
# Wrapper: prologue + heads pallas_calls, then unpack the packed slabs.
# ---------------------------------------------------------------------------
def decoder_totalvi(z, library_gene, eps, packed, n_genes, n_proteins):
    f32 = jnp.float32
    B, D = z.shape
    H = packed["Wh"].shape[1] // 4
    Ng_p = packed["Wg"].shape[1]
    Np_p = packed["Wp_fore"].shape[1]
    Ng, Np = n_genes, n_proteins

    vmem = pl.BlockSpec(memory_space=pltpu.MemorySpace.VMEM)

    # ---- prologue: hidden activations (BN over the full, un-padded batch) ----
    hid = pl.pallas_call(
        hidden_kernel,
        out_shape=jax.ShapeDtypeStruct((B, 4 * H), f32),
        in_specs=[vmem] * 5,
        out_specs=vmem,
    )(z.astype(f32), packed["Wh"], packed["bh"], packed["gh"], packed["beh"])

    # ---- heads: row-parallel grid over B tiles --------------------------------
    # Padding rows AFTER batch-norm cannot perturb the batch statistics.
    Bt = 128 if B > 128 else _round_up(B, 8)
    B_pad = _round_up(B, Bt)
    nB = B_pad // Bt

    def pad_rows(a):
        return jnp.pad(a, ((0, B_pad - B), (0, 0)))

    hid_p = pad_rows(hid)
    z_p = pad_rows(z.astype(f32))
    lib_p = pad_rows(library_gene.astype(f32))
    eps_p = jnp.pad(eps.astype(f32), ((0, B_pad - B), (0, Np_p - Np)))

    row = lambda b: (b, 0)
    whole = lambda b: (0, 0)
    Wz_cols = packed["Wz"].shape[1]

    in_specs = [
        pl.BlockSpec((Bt, 4 * H), row),           # hid
        pl.BlockSpec((Bt, D), row),               # z
        pl.BlockSpec((Bt, 1), row),               # library_gene
        pl.BlockSpec((Bt, Np_p), row),            # eps
        pl.BlockSpec((D, Wz_cols), whole),        # Wz (resident across B tiles)
        pl.BlockSpec((1, Wz_cols), whole),        # bz
        pl.BlockSpec((H, Ng_p), whole),           # Wg
        pl.BlockSpec((H, 2 * Np_p), whole),       # Wp_ab
        pl.BlockSpec((H, Np_p), whole),           # Wp_fore
        pl.BlockSpec((H, Ng_p + Np_p), whole),    # W_mix
    ]
    out_specs = (pl.BlockSpec((Bt, 3 * Ng_p), row),
                 pl.BlockSpec((Bt, 8 * Np_p), row))
    out_shape = (jax.ShapeDtypeStruct((B_pad, 3 * Ng_p), f32),
                 jax.ShapeDtypeStruct((B_pad, 8 * Np_p), f32))

    # Per-step footprint: resident weight slabs + double-buffered B-tile I/O +
    # elementwise intermediates; capped below physical VMEM (v7x = 64 MiB / TC).
    weight_bytes = sum(int(packed[k].size) * packed[k].dtype.itemsize
                       for k in ("Wz", "bz", "Wg", "Wp_ab", "Wp_fore", "W_mix"))
    tile_io = 4 * (Bt * (4 * H + D + 1 + Np_p) + Bt * (3 * Ng_p + 8 * Np_p))
    interm = 4 * 4 * Bt * (2 * Ng_p + 4 * Np_p)
    vmem_limit = int(min(48 * 2 ** 20,
                         max(32 * 2 ** 20, 2 * (weight_bytes + tile_io) + interm)))

    gene, prot = pl.pallas_call(
        make_heads_kernel(H, Ng_p, Np_p),
        grid=(nB,),
        in_specs=in_specs,
        out_specs=out_specs,
        out_shape=out_shape,
        compiler_params=pltpu.CompilerParams(
            dimension_semantics=("parallel",),
            vmem_limit_bytes=vmem_limit),
    )(hid_p, z_p, lib_p, eps_p,
      packed["Wz"], packed["bz"], packed["Wg"],
      packed["Wp_ab"], packed["Wp_fore"], packed["W_mix"])

    gene = gene[:B]
    prot = prot[:B]

    px_ = {"scale": gene[:, 0:Ng],
           "rate": gene[:, Ng_p:Ng_p + Ng],
           "dropout": gene[:, 2 * Ng_p:2 * Ng_p + Ng]}
    py_ = {"back_alpha": prot[:, 0:Np],
           "back_beta": prot[:, Np_p:Np_p + Np],
           "rate_back": prot[:, 3 * Np_p:3 * Np_p + Np],
           "fore_scale": prot[:, 4 * Np_p:4 * Np_p + Np],
           "rate_fore": prot[:, 5 * Np_p:5 * Np_p + Np],
           "mixing": prot[:, 6 * Np_p:6 * Np_p + Np],
           "scale": prot[:, 7 * Np_p:7 * Np_p + Np]}
    log_pro_back_mean = prot[:, 2 * Np_p:2 * Np_p + Np]
    return px_, py_, log_pro_back_mean


# ---------------------------------------------------------------------------
# Pure-JAX reference mirroring the torch forward (same bf16 weight casting).
# ---------------------------------------------------------------------------
def reference_forward(z, library_gene, eps, raw):
    bf16, f32 = jnp.bfloat16, jnp.float32

    def hidden(dec):
        h = jnp.dot(z.astype(bf16), dec["W"].astype(bf16),
                    preferred_element_type=f32) + dec["b"]
        mu = jnp.mean(h, 0, keepdims=True)
        d = h - mu
        var = jnp.mean(d * d, 0, keepdims=True)
        return jnp.maximum(d * jax.lax.rsqrt(var + BN_EPS) * dec["gamma"] + dec["beta"], 0.0)

    def head(h, lin):
        x = jnp.concatenate([h, z], axis=-1).astype(bf16)
        return jnp.dot(x, lin["W"].astype(bf16), preferred_element_type=f32) + lin["b"]

    px, back, fore, mix = (hidden(raw[k]) for k in ("px_dec", "back_dec", "fore_dec", "mix_dec"))
    out = {}
    out["px_scale"] = jax.nn.softmax(head(px, raw["px_scale"]), axis=-1)
    out["px_rate"] = library_gene * out["px_scale"]
    out["px_dropout"] = head(mix, raw["px_dropout"])
    out["back_alpha"] = head(back, raw["back_alpha"])
    out["back_beta"] = jnp.exp(head(back, raw["back_beta"]))
    out["log_back"] = out["back_alpha"] + out["back_beta"] * eps
    out["rate_back"] = jnp.exp(out["log_back"])
    out["fore_scale"] = jnp.maximum(head(fore, raw["fore_scale"]), 0.0) + 1.0 + 1e-8
    out["rate_fore"] = out["rate_back"] * out["fore_scale"]
    out["mixing"] = head(mix, raw["mixing"])
    pm = 1.0 / (1.0 + jnp.exp(-out["mixing"]))
    s = (1.0 - pm) * out["rate_fore"]
    out["py_scale"] = s / jnp.maximum(jnp.sum(jnp.abs(s), -1, keepdims=True), 1e-12)
    return out


if __name__ == "__main__":
    B, n_input, n_hidden = 8, 16, 32
    n_genes, n_proteins = 128, 64

    key = jax.random.PRNGKey(0)
    k_param, k_z, k_lib, k_eps = jax.random.split(key, 4)

    raw = init_raw_params(k_param, n_input, n_hidden, n_genes, n_proteins)
    packed = pack_params(raw, n_genes, n_proteins)

    z = jax.random.normal(k_z, (B, n_input), jnp.float32)
    library_gene = jnp.exp(1.0 + 0.5 * jax.random.normal(k_lib, (B, 1), jnp.float32))
    # TODO(synk): Normal(alpha, beta).rsample() draws RNG inside the torch module; here the
    # standard-normal noise is drawn in JAX and passed in (reparameterized alpha + beta * eps).
    eps = jax.random.normal(k_eps, (B, n_proteins), jnp.float32)

    fwd = jax.jit(functools.partial(decoder_totalvi,
                                    n_genes=n_genes, n_proteins=n_proteins))
    px_, py_, log_pro_back_mean = fwd(z, library_gene, eps, packed)
    jax.block_until_ready((px_, py_, log_pro_back_mean))

    # ---- sanity / correctness checks ----
    assert px_["scale"].shape == (B, n_genes)
    assert py_["scale"].shape == (B, n_proteins)
    assert log_pro_back_mean.shape == (B, n_proteins)
    assert bool(jnp.all(jnp.abs(jnp.sum(px_["scale"], -1) - 1.0) < 1e-3))
    assert bool(jnp.all(jnp.abs(jnp.sum(py_["scale"], -1) - 1.0) < 1e-3))

    ref = reference_forward(z, library_gene, eps, raw)
    got = {"px_scale": px_["scale"], "px_rate": px_["rate"], "px_dropout": px_["dropout"],
           "back_alpha": py_["back_alpha"], "back_beta": py_["back_beta"],
           "log_back": log_pro_back_mean, "rate_back": py_["rate_back"],
           "fore_scale": py_["fore_scale"], "rate_fore": py_["rate_fore"],
           "mixing": py_["mixing"], "py_scale": py_["scale"]}
    for name, v in got.items():
        r = ref[name]
        assert bool(jnp.all(jnp.isfinite(v))), name
        err = jnp.max(jnp.abs(v - r) / (1e-3 + jnp.abs(r)))
        assert bool(err < 5e-2), (name, float(err))

    print("KERNEL_OK")
</pallas_src>

<mosaic_0001>
module attributes {stable_mosaic.version = 11 : i64} {
  func.func @kernel(%arg0: i32, %arg1: memref<8x128xf32, #tpu.memory_space<vmem>>, %arg2: memref<8x16xf32, #tpu.memory_space<vmem>>, %arg3: memref<8x1xf32, #tpu.memory_space<vmem>>, %arg4: memref<8x128xf32, #tpu.memory_space<vmem>>, %arg5: memref<16x768xbf16, #tpu.memory_space<vmem>>, %arg6: memref<1x768xf32, #tpu.memory_space<vmem>>, %arg7: memref<32x128xbf16, #tpu.memory_space<vmem>>, %arg8: memref<32x256xbf16, #tpu.memory_space<vmem>>, %arg9: memref<32x128xbf16, #tpu.memory_space<vmem>>, %arg10: memref<32x256xbf16, #tpu.memory_space<vmem>>, %arg11: memref<8x384xf32, #tpu.memory_space<vmem>>, %arg12: memref<8x1024xf32, #tpu.memory_space<vmem>>) attributes {dimension_semantics = [#tpu.dimension_semantics<parallel>], iteration_bounds = array<i64: 1>, scalar_prefetch = 0 : i64, scratch_operands = 0 : i64, tpu.core_type = #tpu.core_type<tc>, window_params = [{transform_indices = @transform_0, window_bounds = array<i64: 8, 128>}, {transform_indices = @transform_1, window_bounds = array<i64: 8, 16>}, {transform_indices = @transform_2, window_bounds = array<i64: 8, 1>}, {transform_indices = @transform_3, window_bounds = array<i64: 8, 128>}, {pipeline_mode = #tpu.pipeline_mode<synchronous>, transform_indices = @transform_4, window_bounds = array<i64: 16, 768>}, {pipeline_mode = #tpu.pipeline_mode<synchronous>, transform_indices = @transform_5, window_bounds = array<i64: 1, 768>}, {pipeline_mode = #tpu.pipeline_mode<synchronous>, transform_indices = @transform_6, window_bounds = array<i64: 32, 128>}, {pipeline_mode = #tpu.pipeline_mode<synchronous>, transform_indices = @transform_7, window_bounds = array<i64: 32, 256>}, {pipeline_mode = #tpu.pipeline_mode<synchronous>, transform_indices = @transform_8, window_bounds = array<i64: 32, 128>}, {pipeline_mode = #tpu.pipeline_mode<synchronous>, transform_indices = @transform_9, window_bounds = array<i64: 32, 256>}, {transform_indices = @transform_10, window_bounds = array<i64: 8, 384>}, {transform_indices = @transform_11, window_bounds = array<i64: 8, 1024>}]} {
    %c0 = arith.constant 0 : index
    %c0_0 = arith.constant 0 : index
    %0 = vector.load %arg2[%c0, %c0_0] : memref<8x16xf32, #tpu.memory_space<vmem>>, vector<8x16xf32>
    %1 = arith.truncf %0 : vector<8x16xf32> to vector<8x16xbf16>
    %c0_1 = arith.constant 0 : index
    %c0_2 = arith.constant 0 : index
    %2 = vector.load %arg3[%c0_1, %c0_2] : memref<8x1xf32, #tpu.memory_space<vmem>>, vector<8x1xf32>
    %c0_3 = arith.constant 0 : index
    %c0_4 = arith.constant 0 : index
    %3 = vector.load %arg4[%c0_3, %c0_4] : memref<8x128xf32, #tpu.memory_space<vmem>>, vector<8x128xf32>
    %c0_5 = arith.constant 0 : index
    %c0_6 = arith.constant 0 : index
    %4 = vector.load %arg1[%c0_5, %c0_6] : memref<8x128xf32, #tpu.memory_space<vmem>>, vector<8x32xf32>
    %5 = arith.truncf %4 : vector<8x32xf32> to vector<8x32xbf16>
    %c0_7 = arith.constant 0 : index
    %c32 = arith.constant 32 : index
    %6 = vector.load %arg1[%c0_7, %c32] : memref<8x128xf32, #tpu.memory_space<vmem>>, vector<8x32xf32>
    %7 = arith.truncf %6 : vector<8x32xf32> to vector<8x32xbf16>
    %c0_8 = arith.constant 0 : index
    %c64 = arith.constant 64 : index
    %8 = vector.load %arg1[%c0_8, %c64] : memref<8x128xf32, #tpu.memory_space<vmem>>, vector<8x32xf32>
    %9 = arith.truncf %8 : vector<8x32xf32> to vector<8x32xbf16>
    %c0_9 = arith.constant 0 : index
    %c96 = arith.constant 96 : index
    %10 = vector.load %arg1[%c0_9, %c96] : memref<8x128xf32, #tpu.memory_space<vmem>>, vector<8x32xf32>
    %11 = arith.truncf %10 : vector<8x32xf32> to vector<8x32xbf16>
    %c0_10 = arith.constant 0 : index
    %c0_11 = arith.constant 0 : index
    %12 = vector.load %arg5[%c0_10, %c0_11] : memref<16x768xbf16, #tpu.memory_space<vmem>>, vector<16x768xbf16>
    %cst = arith.constant dense<0.000000e+00> : vector<8x768xf32>
    %13 = tpu.matmul %1, %12, %cst {dimension_numbers = #tpu.dot_dimension_numbers<[1], [0], [0], [1], [0, 0, 1, 1], [], []>} : vector<8x16xbf16>, vector<16x768xbf16>, vector<8x768xf32> -> vector<8x768xf32>
    %c0_12 = arith.constant 0 : index
    %c0_13 = arith.constant 0 : index
    %14 = vector.load %arg6[%c0_12, %c0_13] : memref<1x768xf32, #tpu.memory_space<vmem>>, vector<1x768xf32>
    %15 = vector.broadcast %14 : vector<1x768xf32> to vector<8x768xf32>
    %16 = arith.addf %13, %15 : vector<8x768xf32>
    %c0_14 = arith.constant 0 : index
    %c0_15 = arith.constant 0 : index
    %17 = vector.load %arg7[%c0_14, %c0_15] : memref<32x128xbf16, #tpu.memory_space<vmem>>, vector<32x128xbf16>
    %cst_16 = arith.constant dense<0.000000e+00> : vector<8x128xf32>
    %18 = tpu.matmul %5, %17, %cst_16 {dimension_numbers = #tpu.dot_dimension_numbers<[1], [0], [0], [1], [0, 0, 1, 1], [], []>} : vector<8x32xbf16>, vector<32x128xbf16>, vector<8x128xf32> -> vector<8x128xf32>
    %19 = vector.extract_strided_slice %16 {offsets = [0, 0], sizes = [8, 128], strides = [1, 1]} : vector<8x768xf32> to vector<8x128xf32>
    %20 = arith.addf %18, %19 : vector<8x128xf32>
    %cst_17 = arith.constant dense<0xFF800000> : vector<8xf32>
    %21 = vector.multi_reduction <maximumf>, %20, %cst_17 [1] : vector<8x128xf32> to vector<8xf32>
    %22 = vector.shape_cast %21 : vector<8xf32> to vector<8x1xf32>
    %23 = vector.broadcast %22 : vector<8x1xf32> to vector<8x128xf32>
    %24 = arith.subf %20, %23 : vector<8x128xf32>
    %25 = math.exp %24 : vector<8x128xf32>
    %cst_18 = arith.constant dense<0.000000e+00> : vector<8xf32>
    %26 = vector.multi_reduction <add>, %25, %cst_18 [1] : vector<8x128xf32> to vector<8xf32>
    %27 = vector.shape_cast %26 : vector<8xf32> to vector<8x1xf32>
    %28 = vector.broadcast %27 : vector<8x1xf32> to vector<8x128xf32>
    %29 = arith.divf %25, %28 : vector<8x128xf32>
    %c0_19 = arith.constant 0 : index
    %c0_20 = arith.constant 0 : index
    %30 = vector.load %arg11[%c0_19, %c0_20] : memref<8x384xf32, #tpu.memory_space<vmem>>, vector<8x128xf32>
    tpu.vector_store %arg11[%c0_19, %c0_20], %29 {strides = array<i32>} : memref<8x384xf32, #tpu.memory_space<vmem>>, vector<8x128xf32>,
    %31 = vector.broadcast %2 : vector<8x1xf32> to vector<8x128xf32>
    %32 = arith.mulf %31, %29 : vector<8x128xf32>
    %c0_21 = arith.constant 0 : index
    %c128 = arith.constant 128 : index
    %33 = vector.load %arg11[%c0_21, %c128] : memref<8x384xf32, #tpu.memory_space<vmem>>, vector<8x128xf32>
    tpu.vector_store %arg11[%c0_21, %c128], %32 {strides = array<i32>} : memref<8x384xf32, #tpu.memory_space<vmem>>, vector<8x128xf32>,
    %c0_22 = arith.constant 0 : index
    %c0_23 = arith.constant 0 : index
    %34 = vector.load %arg8[%c0_22, %c0_23] : memref<32x256xbf16, #tpu.memory_space<vmem>>, vector<32x256xbf16>
    %cst_24 = arith.constant dense<0.000000e+00> : vector<8x256xf32>
    %35 = tpu.matmul %7, %34, %cst_24 {dimension_numbers = #tpu.dot_dimension_numbers<[1], [0], [0], [1], [0, 0, 1, 1], [], []>} : vector<8x32xbf16>, vector<32x256xbf16>, vector<8x256xf32> -> vector<8x256xf32>
    %36 = vector.extract_strided_slice %16 {offsets = [0, 256], sizes = [8, 256], strides = [1, 1]} : vector<8x768xf32> to vector<8x256xf32>
    %37 = arith.addf %35, %36 : vector<8x256xf32>
    %38 = vector.extract_strided_slice %37 {offsets = [0, 0], sizes = [8, 128], strides = [1, 1]} : vector<8x256xf32> to vector<8x128xf32>
    %39 = vector.extract_strided_slice %37 {offsets = [0, 128], sizes = [8, 128], strides = [1, 1]} : vector<8x256xf32> to vector<8x128xf32>
    %40 = math.exp %39 : vector<8x128xf32>
    %c0_25 = arith.constant 0 : index
    %c0_26 = arith.constant 0 : index
    %41 = vector.load %arg12[%c0_25, %c0_26] : memref<8x1024xf32, #tpu.memory_space<vmem>>, vector<8x128xf32>
    tpu.vector_store %arg12[%c0_25, %c0_26], %38 {strides = array<i32>} : memref<8x1024xf32, #tpu.memory_space<vmem>>, vector<8x128xf32>,
    %c0_27 = arith.constant 0 : index
    %c128_28 = arith.constant 128 : index
    %42 = vector.load %arg12[%c0_27, %c128_28] : memref<8x1024xf32, #tpu.memory_space<vmem>>, vector<8x128xf32>
    tpu.vector_store %arg12[%c0_27, %c128_28], %40 {strides = array<i32>} : memref<8x1024xf32, #tpu.memory_space<vmem>>, vector<8x128xf32>,
    %43 = arith.mulf %40, %3 : vector<8x128xf32>
    %44 = arith.addf %38, %43 : vector<8x128xf32>
    %45 = math.exp %44 : vector<8x128xf32>
    %c0_29 = arith.constant 0 : index
    %c256 = arith.constant 256 : index
    %46 = vector.load %arg12[%c0_29, %c256] : memref<8x1024xf32, #tpu.memory_space<vmem>>, vector<8x128xf32>
    tpu.vector_store %arg12[%c0_29, %c256], %44 {strides = array<i32>} : memref<8x1024xf32, #tpu.memory_space<vmem>>, vector<8x128xf32>,
    %c0_30 = arith.constant 0 : index
    %c384 = arith.constant 384 : index
    %47 = vector.load %arg12[%c0_30, %c384] : memref<8x1024xf32, #tpu.memory_space<vmem>>, vector<8x128xf32>
    tpu.vector_store %arg12[%c0_30, %c384], %45 {strides = array<i32>} : memref<8x1024xf32, #tpu.memory_space<vmem>>, vector<8x128xf32>,
    %c0_31 = arith.constant 0 : index
    %c0_32 = arith.constant 0 : index
    %48 = vector.load %arg9[%c0_31, %c0_32] : memref<32x128xbf16, #tpu.memory_space<vmem>>, vector<32x128xbf16>
    %cst_33 = arith.constant dense<0.000000e+00> : vector<8x128xf32>
    %49 = tpu.matmul %9, %48, %cst_33 {dimension_numbers = #tpu.dot_dimension_numbers<[1], [0], [0], [1], [0, 0, 1, 1], [], []>} : vector<8x32xbf16>, vector<32x128xbf16>, vector<8x128xf32> -> vector<8x128xf32>
    %50 = vector.extract_strided_slice %16 {offsets = [0, 512], sizes = [8, 128], strides = [1, 1]} : vector<8x768xf32> to vector<8x128xf32>
    %51 = arith.addf %49, %50 : vector<8x128xf32>
    %cst_34 = arith.constant 0.000000e+00 : f32
    %52 = vector.broadcast %cst_34 : f32 to vector<8x128xf32>
    %53 = arith.maximumf %51, %52 : vector<8x128xf32>
    %cst_35 = arith.constant 1.000000e+00 : f32
    %54 = vector.broadcast %cst_35 : f32 to vector<8x128xf32>
    %55 = arith.addf %53, %54 : vector<8x128xf32>
    %56 = arith.mulf %45, %55 : vector<8x128xf32>
    %c0_36 = arith.constant 0 : index
    %c512 = arith.constant 512 : index
    %57 = vector.load %arg12[%c0_36, %c512] : memref<8x1024xf32, #tpu.memory_space<vmem>>, vector<8x128xf32>
    tpu.vector_store %arg12[%c0_36, %c512], %55 {strides = array<i32>} : memref<8x1024xf32, #tpu.memory_space<vmem>>, vector<8x128xf32>,
    %c0_37 = arith.constant 0 : index
    %c640 = arith.constant 640 : index
    %58 = vector.load %arg12[%c0_37, %c640] : memref<8x1024xf32, #tpu.memory_space<vmem>>, vector<8x128xf32>
    tpu.vector_store %arg12[%c0_37, %c640], %56 {strides = array<i32>} : memref<8x1024xf32, #tpu.memory_space<vmem>>, vector<8x128xf32>,
    %c0_38 = arith.constant 0 : index
    %c0_39 = arith.constant 0 : index
    %59 = vector.load %arg10[%c0_38, %c0_39] : memref<32x256xbf16, #tpu.memory_space<vmem>>, vector<32x256xbf16>
    %cst_40 = arith.constant dense<0.000000e+00> : vector<8x256xf32>
    %60 = tpu.matmul %11, %59, %cst_40 {dimension_numbers = #tpu.dot_dimension_numbers<[1], [0], [0], [1], [0, 0, 1, 1], [], []>} : vector<8x32xbf16>, vector<32x256xbf16>, vector<8x256xf32> -> vector<8x256xf32>
    %61 = vector.extract_strided_slice %60 {offsets = [0, 0], sizes = [8, 128], strides = [1, 1]} : vector<8x256xf32> to vector<8x128xf32>
    %62 = vector.extract_strided_slice %16 {offsets = [0, 128], sizes = [8, 128], strides = [1, 1]} : vector<8x768xf32> to vector<8x128xf32>
    %63 = arith.addf %61, %62 : vector<8x128xf32>
    %c0_41 = arith.constant 0 : index
    %c256_42 = arith.constant 256 : index
    %64 = vector.load %arg11[%c0_41, %c256_42] : memref<8x384xf32, #tpu.memory_space<vmem>>, vector<8x128xf32>
    tpu.vector_store %arg11[%c0_41, %c256_42], %63 {strides = array<i32>} : memref<8x384xf32, #tpu.memory_space<vmem>>, vector<8x128xf32>,
    %65 = vector.extract_strided_slice %60 {offsets = [0, 128], sizes = [8, 128], strides = [1, 1]} : vector<8x256xf32> to vector<8x128xf32>
    %66 = vector.extract_strided_slice %16 {offsets = [0, 640], sizes = [8, 128], strides = [1, 1]} : vector<8x768xf32> to vector<8x128xf32>
    %67 = arith.addf %65, %66 : vector<8x128xf32>
    %c0_43 = arith.constant 0 : index
    %c768 = arith.constant 768 : index
    %68 = vector.load %arg12[%c0_43, %c768] : memref<8x1024xf32, #tpu.memory_space<vmem>>, vector<8x128xf32>
    tpu.vector_store %arg12[%c0_43, %c768], %67 {strides = array<i32>} : memref<8x1024xf32, #tpu.memory_space<vmem>>, vector<8x128xf32>,
    %cst_44 = arith.constant 0.000000e+00 : f32
    %69 = vector.broadcast %cst_44 : f32 to vector<8x128xf32>
    %70 = arith.subf %69, %67 : vector<8x128xf32>
    %71 = math.exp %70 : vector<8x128xf32>
    %cst_45 = arith.constant 1.000000e+00 : f32
    %72 = vector.broadcast %cst_45 : f32 to vector<8x128xf32>
    %73 = arith.addf %72, %71 : vector<8x128xf32>
    %cst_46 = arith.constant 1.000000e+00 : f32
    %74 = vector.broadcast %cst_46 : f32 to vector<8x128xf32>
    %75 = arith.divf %74, %73 : vector<8x128xf32>
    %cst_47 = arith.constant 1.000000e+00 : f32
    %76 = vector.broadcast %cst_47 : f32 to vector<8x128xf32>
    %77 = arith.subf %76, %75 : vector<8x128xf32>
    %78 = arith.mulf %77, %56 : vector<8x128xf32>
    %79 = math.absf %78 : vector<8x128xf32>
    %cst_48 = arith.constant dense<0.000000e+00> : vector<8xf32>
    %80 = vector.multi_reduction <add>, %79, %cst_48 [1] : vector<8x128xf32> to vector<8xf32>
    %81 = vector.shape_cast %80 : vector<8xf32> to vector<8x1xf32>
    %cst_49 = arith.constant 9.99999996E-13 : f32
    %82 = vector.broadcast %cst_49 : f32 to vector<8x1xf32>
    %83 = arith.maximumf %81, %82 : vector<8x1xf32>
    %84 = vector.broadcast %83 : vector<8x1xf32> to vector<8x128xf32>
    %85 = arith.divf %78, %84 : vector<8x128xf32>
    %c0_50 = arith.constant 0 : index
    %c896 = arith.constant 896 : index
    %86 = vector.load %arg12[%c0_50, %c896] : memref<8x1024xf32, #tpu.memory_space<vmem>>, vector<8x128xf32>
    tpu.vector_store %arg12[%c0_50, %c896], %85 {strides = array<i32>} : memref<8x1024xf32, #tpu.memory_space<vmem>>, vector<8x128xf32>,
    return
  }
  func.func @transform_0(%arg0: i32) -> (i32, i32) {
    %c0_i32 = arith.constant 0 : i32
    %c0_i32_0 = arith.constant 0 : i32
    return %arg0, %c0_i32 : i32, i32
  }
  func.func @transform_1(%arg0: i32) -> (i32, i32) {
    %c0_i32 = arith.constant 0 : i32
    %c0_i32_0 = arith.constant 0 : i32
    return %arg0, %c0_i32 : i32, i32
  }
  func.func @transform_2(%arg0: i32) -> (i32, i32) {
    %c0_i32 = arith.constant 0 : i32
    %c0_i32_0 = arith.constant 0 : i32
    return %arg0, %c0_i32 : i32, i32
  }
  func.func @transform_3(%arg0: i32) -> (i32, i32) {
    %c0_i32 = arith.constant 0 : i32
    %c0_i32_0 = arith.constant 0 : i32
    return %arg0, %c0_i32 : i32, i32
  }
  func.func @transform_4(%arg0: i32) -> (i32, i32) {
    %c0_i32 = arith.constant 0 : i32
    %c0_i32_0 = arith.constant 0 : i32
    %c0_i32_1 = arith.constant 0 : i32
    return %c0_i32, %c0_i32_0 : i32, i32
  }
  func.func @transform_5(%arg0: i32) -> (i32, i32) {
    %c0_i32 = arith.constant 0 : i32
    %c0_i32_0 = arith.constant 0 : i32
    %c0_i32_1 = arith.constant 0 : i32
    return %c0_i32, %c0_i32_0 : i32, i32
  }
  func.func @transform_6(%arg0: i32) -> (i32, i32) {
    %c0_i32 = arith.constant 0 : i32
    %c0_i32_0 = arith.constant 0 : i32
    %c0_i32_1 = arith.constant 0 : i32
    return %c0_i32, %c0_i32_0 : i32, i32
  }
  func.func @transform_7(%arg0: i32) -> (i32, i32) {
    %c0_i32 = arith.constant 0 : i32
    %c0_i32_0 = arith.constant 0 : i32
    %c0_i32_1 = arith.constant 0 : i32
    return %c0_i32, %c0_i32_0 : i32, i32
  }
  func.func @transform_8(%arg0: i32) -> (i32, i32) {
    %c0_i32 = arith.constant 0 : i32
    %c0_i32_0 = arith.constant 0 : i32
    %c0_i32_1 = arith.constant 0 : i32
    return %c0_i32, %c0_i32_0 : i32, i32
  }
  func.func @transform_9(%arg0: i32) -> (i32, i32) {
    %c0_i32 = arith.constant 0 : i32
    %c0_i32_0 = arith.constant 0 : i32
    %c0_i32_1 = arith.constant 0 : i32
    return %c0_i32, %c0_i32_0 : i32, i32
  }
  func.func @transform_10(%arg0: i32) -> (i32, i32) {
    %c0_i32 = arith.constant 0 : i32
    %c0_i32_0 = arith.constant 0 : i32
    return %arg0, %c0_i32 : i32, i32
  }
  func.func @transform_11(%arg0: i32) -> (i32, i32) {
    %c0_i32 = arith.constant 0 : i32
    %c0_i32_0 = arith.constant 0 : i32
    return %arg0, %c0_i32 : i32, i32
  }
}

module attributes {stable_mosaic.version = 11 : i64} {
  func.func @hidden_kernel(%arg0: memref<8x16xf32, #tpu.memory_space<vmem>>, %arg1: memref<16x128xbf16, #tpu.memory_space<vmem>>, %arg2: memref<1x128xf32, #tpu.memory_space<vmem>>, %arg3: memref<1x128xf32, #tpu.memory_space<vmem>>, %arg4: memref<1x128xf32, #tpu.memory_space<vmem>>, %arg5: memref<8x128xf32, #tpu.memory_space<vmem>>) attributes {dimension_semantics = [], scalar_prefetch = 0 : i64, scratch_operands = 0 : i64, tpu.core_type = #tpu.core_type<tc>} {
    %c0 = arith.constant 0 : index
    %c0_0 = arith.constant 0 : index
    %0 = vector.load %arg0[%c0, %c0_0] : memref<8x16xf32, #tpu.memory_space<vmem>>, vector<8x16xf32>
    %1 = arith.truncf %0 : vector<8x16xf32> to vector<8x16xbf16>
    %c0_1 = arith.constant 0 : index
    %c0_2 = arith.constant 0 : index
    %2 = vector.load %arg1[%c0_1, %c0_2] : memref<16x128xbf16, #tpu.memory_space<vmem>>, vector<16x128xbf16>
    %cst = arith.constant dense<0.000000e+00> : vector<8x128xf32>
    %3 = tpu.matmul %1, %2, %cst {dimension_numbers = #tpu.dot_dimension_numbers<[1], [0], [0], [1], [0, 0, 1, 1], [], []>} : vector<8x16xbf16>, vector<16x128xbf16>, vector<8x128xf32> -> vector<8x128xf32>
    %c0_3 = arith.constant 0 : index
    %c0_4 = arith.constant 0 : index
    %4 = vector.load %arg2[%c0_3, %c0_4] : memref<1x128xf32, #tpu.memory_space<vmem>>, vector<1x128xf32>
    %5 = vector.broadcast %4 : vector<1x128xf32> to vector<8x128xf32>
    %6 = arith.addf %3, %5 : vector<8x128xf32>
    %cst_5 = arith.constant dense<0.000000e+00> : vector<128xf32>
    %7 = vector.multi_reduction <add>, %6, %cst_5 [0] : vector<8x128xf32> to vector<128xf32>
    %8 = vector.shape_cast %7 : vector<128xf32> to vector<1x128xf32>
    %cst_6 = arith.constant 8.000000e+00 : f32
    %9 = vector.broadcast %cst_6 : f32 to vector<1x128xf32>
    %10 = arith.divf %8, %9 : vector<1x128xf32>
    %11 = vector.broadcast %10 : vector<1x128xf32> to vector<8x128xf32>
    %12 = arith.subf %6, %11 : vector<8x128xf32>
    %13 = arith.mulf %12, %12 : vector<8x128xf32>
    %cst_7 = arith.constant dense<0.000000e+00> : vector<128xf32>
    %14 = vector.multi_reduction <add>, %13, %cst_7 [0] : vector<8x128xf32> to vector<128xf32>
    %15 = vector.shape_cast %14 : vector<128xf32> to vector<1x128xf32>
    %cst_8 = arith.constant 8.000000e+00 : f32
    %16 = vector.broadcast %cst_8 : f32 to vector<1x128xf32>
    %17 = arith.divf %15, %16 : vector<1x128xf32>
    %cst_9 = arith.constant 1.000000e-03 : f32
    %18 = vector.broadcast %cst_9 : f32 to vector<1x128xf32>
    %19 = arith.addf %17, %18 : vector<1x128xf32>
    %20 = math.rsqrt %19 : vector<1x128xf32>
    %21 = vector.broadcast %20 : vector<1x128xf32> to vector<8x128xf32>
    %22 = arith.mulf %12, %21 : vector<8x128xf32>
    %c0_10 = arith.constant 0 : index
    %c0_11 = arith.constant 0 : index
    %23 = vector.load %arg3[%c0_10, %c0_11] : memref<1x128xf32, #tpu.memory_space<vmem>>, vector<1x128xf32>
    %24 = vector.broadcast %23 : vector<1x128xf32> to vector<8x128xf32>
    %25 = arith.mulf %22, %24 : vector<8x128xf32>
    %c0_12 = arith.constant 0 : index
    %c0_13 = arith.constant 0 : index
    %26 = vector.load %arg4[%c0_12, %c0_13] : memref<1x128xf32, #tpu.memory_space<vmem>>, vector<1x128xf32>
    %27 = vector.broadcast %26 : vector<1x128xf32> to vector<8x128xf32>
    %28 = arith.addf %25, %27 : vector<8x128xf32>
    %cst_14 = arith.constant 0.000000e+00 : f32
    %29 = vector.broadcast %cst_14 : f32 to vector<8x128xf32>
    %30 = arith.maximumf %28, %29 : vector<8x128xf32>
    %c0_15 = arith.constant 0 : index
    %c0_16 = arith.constant 0 : index
    %31 = vector.load %arg5[%c0_15, %c0_16] : memref<8x128xf32, #tpu.memory_space<vmem>>, vector<8x128xf32>
    tpu.vector_store %arg5[%c0_15, %c0_16], %30 {strides = array<i32>} : memref<8x128xf32, #tpu.memory_space<vmem>>, vector<8x128xf32>,
    return
  }
}

</mosaic_0001>

<bundles_post_ra>
// kernel: decoder_totalvi.2
= control target key start
LH: loop header
LB: loop body
LE: loop exit
PB: predicated region body
PF: predicated region fallthrough
CT: control target
= control target key end

     0   :  { %10 = vsyncpa [#allocation3], 0  ;;  %s182_s18 = smov [#allocation2]   ;;  %s235_s0 = inlined_call_operand.vmem [shape: f32[8,16], index: 0, kind: input, shape index: {}]   ;;  %s236_s1 = inlined_call_operand.hbm [shape: bf16[16,128], index: 1, kind: input, shape index: {}]   ;;  %s237_s2 = inlined_call_operand.vmem [shape: f32[1,128], index: 2, kind: input, shape index: {}]   ;;  %s238_s3 = inlined_call_operand.vmem [shape: f32[1,128], index: 3, kind: input, shape index: {}]   ;;  %s239_s4 = inlined_call_operand.vmem [shape: f32[1,128], index: 4, kind: input, shape index: {}]   ;;  %s240_s5 = inlined_call_operand.vmem [shape: f32[8,128], index: 5, kind: output, shape index: {}]  }
   0x1   :  { %s18_s19 = sshll.u32 %s182_s18, 4  ;;  %s19_s19 = int_to_ptr.vmem [resolvable:$true] %s18_s19 }
   0x2   :  { %s168_s20 = scalar_lea.vmem %s19_s19, 128  ;;  %p173_p1 = scmp.lt.s32.totalorder %s19_s19, %s19_s19 }
   0x3   :  { %p169_p0 = scmp.ne.s32.totalorder %s19_s19, %s168_s20  ;;  %p174_p2 = scmp.lt.s32.totalorder %s168_s20, %s168_s20 }
   0x5   :  { %p175_p3 = por %p174_p2, %p173_p1 }
   0x7   :  { %p176_p4 = pnand %p175_p3, %p169_p0 }
   0x9   :  { %179 = shalt.err (!%p176_p4)
}
   0xa   :  { %s183_s21 = smov 64   ;;  %s184_s22 = smov 4  }
   0xb   :  { %24 = dma.hbm_to_vmem [thread:$0]  %s236_s1, 128, %s19_s19, [#allocation3], %s183_s21, %s183_s21, %s184_s22  }
   0xc   :  { %180 = dma.done.wait [#allocation3], 128  }
   0xd   :  { %181 = vsyncadd [#allocation3], 4294967168  ;;  %v185_v0 = vmov 0.0   ;;  %vm186_vm0 = vmmov 0   ;;  %v157_v1 = vld [vmem:[#allocation2] sm:$0xff]   ;;  %vm52_vm1 = vcmask 130048  }
   0xe   :  { %146 = vmatprep.subr.bf16.mxu0 %v185_v0  ;;  %148 = vmatprep.mubr.msk.bf16.mxu0 %vm186_vm0, %v185_v0  ;;  %v35_v2 = vld [vmem:[%s235_s0] sm:$0xff] }
   0xf   :  { %147 = vmatpush3.bf16.msra.mxu0 %v157_v1  ;;  %v36_v3 = vpack.c.bf16 %v35_v2, %v35_v2  ;;  %v139_v4 = vld [vmem:[%s237_s2] ss:$0 sm:$0xff] }
  0x10   :  { %v142_v28 = vld [vmem:[%s238_s3] ss:$0 sm:$0xff] }
  0x11   :  { %v143_v30 = vld [vmem:[%s239_s4] ss:$0 sm:$0xff] }
  0x12   :  { %149 = vmatmul.mubr.msk.bf16.vlgmr.msra.gmra.mxu0 %vm52_vm1, %v36_v3 }
  0xd2   :  { %v90_v5 = vpop.f32.mrf.mxu0 }
  0xd3   :  { %v91_v6 = vadd.f32 %v139_v4, %v90_v5 }
  0xd4   :  { %v150_v7 = vpop.f32.mrf.mxu0 }
  0xd5   :  { %v96_v8 = vrot.slane %v91_v6, 4 }
  0xd6   :  { %v93_v9 = vpop.f32.mrf.mxu0 }
  0xd7   :  { %v97_v10 = vadd.f32 %v96_v8, %v91_v6 }
  0xd8   :  { %v151_v11 = vpop.f32.mrf.mxu0 }
  0xd9   :  { %v98_v12 = vrot.slane %v97_v10, 2 }
  0xdb   :  { %v99_v13 = vadd.f32 %v98_v12, %v97_v10 }
  0xdd   :  { %v100_v14 = vrot.slane %v99_v13, 1 }
  0xdf   :  { %v101_v15 = vadd.f32 %v100_v14, %v99_v13 }
  0xe1   :  { %v103_v16 = vmul.f32 0.125, %v101_v15 }
  0xe3   :  { %v104_v17 = vsub.f32 %v91_v6, %v103_v16 }
  0xe5   :  { %v105_v18 = vmul.f32 %v104_v17, %v104_v17 }
  0xe7   :  { %v106_v19 = vrot.slane %v105_v18, 4 }
  0xe9   :  { %v107_v20 = vadd.f32 %v106_v19, %v105_v18 }
  0xeb   :  { %v108_v21 = vrot.slane %v107_v20, 2 }
  0xed   :  { %v109_v22 = vadd.f32 %v108_v21, %v107_v20 }
  0xef   :  { %v110_v23 = vrot.slane %v109_v22, 1 }
  0xf1   :  { %v111_v24 = vadd.f32 %v110_v23, %v109_v22 }
  0xf3   :  { %v112_v25 = vmul.f32 0.125, %v111_v24 }
  0xf5   :  { %v113_v26 = vadd.f32 0.001, %v112_v25 }
  0xf7   :  { %158 = vrsqrt.f32 %v113_v26 }
 0x104   :  { %v159_v27 = vpop.eup %158 }
 0x105   :  { %v115_v29 = vmul.f32 %v159_v27, %v104_v17 }
 0x107   :  { %v123_v31 = vmul.f32 %v142_v28, %v115_v29 }
 0x109   :  { %v131_v32 = vadd.f32 %v143_v30, %v123_v31 }
 0x10b   :  { %v132_v33 = vmax.f32 %v131_v32, 0.0 }
 0x10d   :  { %133 = vst [vmem:[%s240_s5] sm:$0xff] %v132_v33 }
 0x10e   :  { %138 = vsyncpa [#allocation3], 1 }

// kernel: decoder_totalvi.3
= control target key start
LH: loop header
LB: loop body
LE: loop exit
PB: predicated region body
PF: predicated region fallthrough
CT: control target
= control target key end

     0   :  { %17 = vsyncpa [#allocation3], 0  ;;  %s987_s0 = inlined_call_operand.vmem [shape: f32[8,128], index: 0, kind: input, shape index: {}]   ;;  %s988_s1 = inlined_call_operand.vmem [shape: f32[8,16], index: 1, kind: input, shape index: {}]   ;;  %s989_s2 = inlined_call_operand.vmem [shape: f32[8,1], index: 2, kind: input, shape index: {}]   ;;  %s990_s3 = inlined_call_operand.vmem [shape: f32[8,128], index: 3, kind: input, shape index: {}]   ;;  %s991_s4 = inlined_call_operand.vmem [shape: bf16[16,768], index: 4, kind: input, shape index: {}]   ;;  %s992_s5 = inlined_call_operand.vmem [shape: f32[1,768], index: 5, kind: input, shape index: {}]   ;;  %s993_s6 = inlined_call_operand.hbm [shape: bf16[32,128], index: 6, kind: input, shape index: {}]   ;;  %s994_s7 = inlined_call_operand.hbm [shape: bf16[32,256], index: 7, kind: input, shape index: {}]   ;;  %s995_s8 = inlined_call_operand.hbm [shape: bf16[32,128], index: 8, kind: input, shape index: {}]   ;;  %s996_s9 = inlined_call_operand.hbm [shape: bf16[32,256], index: 9, kind: input, shape index: {}]   ;;  %s997_s10 = inlined_call_operand.vmem [shape: f32[8,384], index: 10, kind: output, shape index: {0}]   ;;  %s998_s11 = inlined_call_operand.vmem [shape: f32[8,1024], index: 11, kind: output, shape index: {1}]  }
   0x1   :  { %18 = vsyncpa [#allocation5], 0 }
   0x2   :  { %19 = vsyncpa [#allocation8], 0  ;;  %s805_s17 = smov [#allocation4]  }
   0x3   :  { %s49_s18 = sshll.u32 %s805_s17, 4  ;;  %s50_s18 = int_to_ptr.vmem [resolvable:$true] %s49_s18 }
   0x4   :  { %s727_s19 = scalar_lea.vmem %s50_s18, 512  ;;  %p732_p1 = scmp.lt.s32.totalorder %s50_s18, %s50_s18 }
   0x5   :  { %p728_p0 = scmp.ne.s32.totalorder %s50_s18, %s727_s19  ;;  %p733_p2 = scmp.lt.s32.totalorder %s727_s19, %s727_s19 }
   0x7   :  { %p734_p3 = por %p733_p2, %p732_p1 }
   0x9   :  { %p735_p4 = pnand %p734_p3, %p728_p0 }
   0xb   :  { %738 = shalt.err (!%p735_p4)
}
   0xc   :  { %s806_s20 = smov 128   ;;  %s807_s21 = smov 8  }
   0xd   :  { %55 = dma.hbm_to_vmem [thread:$0]  %s994_s7, 512, %s50_s18, [#allocation5], %s806_s20, %s806_s20, %s807_s21  }
   0xe   :  { %s808_s24 = smov [#allocation2]  }
   0xf   :  { %s37_s25 = sshll.u32 %s808_s24, 4  ;;  %s38_s25 = int_to_ptr.vmem [resolvable:$true] %s37_s25 }
  0x10   :  { %s747_s26 = scalar_lea.vmem %s38_s25, 256  ;;  %p752_p6 = scmp.lt.s32.totalorder %s38_s25, %s38_s25 }
  0x11   :  { %p748_p5 = scmp.ne.s32.totalorder %s38_s25, %s747_s26  ;;  %p753_p7 = scmp.lt.s32.totalorder %s747_s26, %s747_s26 }
  0x13   :  { %p754_p8 = por %p753_p7, %p752_p6 }
  0x15   :  { %p755_p9 = pnand %p754_p8, %p748_p5 }
  0x17   :  { %758 = shalt.err (!%p755_p9)
}
  0x18   :  { %s809_s27 = smov 64   ;;  %s810_s28 = smov 4  }
  0x19   :  { %43 = dma.hbm_to_vmem [thread:$0]  %s993_s6, 256, %s38_s25, [#allocation3], %s809_s27, %s809_s27, %s810_s28  }
  0x1a   :  { %s811_s12 = smov [#allocation6]   ;;  %s812_s13 = smov [#allocation7]  }
  0x1b   :  { %s61_s7 = sshll.u32 %s811_s12, 4  ;;  %s73_s14 = sshll.u32 %s812_s13, 4  ;;  %s62_s7 = int_to_ptr.vmem [resolvable:$true] %s61_s7  ;;  %s74_s14 = int_to_ptr.vmem [resolvable:$true] %s73_s14 }
  0x1c   :  { %s767_s15 = scalar_lea.vmem %s62_s7, 256  ;;  %p772_p11 = scmp.lt.s32.totalorder %s62_s7, %s62_s7 }
  0x1d   :  { %p768_p10 = scmp.ne.s32.totalorder %s62_s7, %s767_s15  ;;  %p773_p12 = scmp.lt.s32.totalorder %s767_s15, %s767_s15 }
  0x1f   :  { %p774_p13 = por %p773_p12, %p772_p11 }
  0x21   :  { %p775_p0 = pnand %p774_p13, %p768_p10 }
  0x23   :  { %778 = shalt.err (!%p775_p0)
}
  0x24   :  { %67 = dma.hbm_to_vmem [thread:$0]  %s995_s8, 256, %s62_s7, [#allocation5], %s809_s27, %s809_s27, %s810_s28  }
  0x25   :  { %s787_s6 = scalar_lea.vmem %s74_s14, 512  ;;  %p792_p2 = scmp.lt.s32.totalorder %s74_s14, %s74_s14 }
  0x26   :  { %p788_p1 = scmp.ne.s32.totalorder %s74_s14, %s787_s6  ;;  %p793_p3 = scmp.lt.s32.totalorder %s787_s6, %s787_s6 }
  0x28   :  { %p794_p4 = por %p793_p3, %p792_p2 }
  0x2a   :  { %p795_p5 = pnand %p794_p4, %p788_p1 }
  0x2c   :  { %798 = shalt.err (!%p795_p5)
}
  0x2d   :  { %79 = dma.hbm_to_vmem [thread:$0]  %s996_s9, 512, %s74_s14, [#allocation8], %s806_s20, %s806_s20, %s807_s21  }
  0x2e   :  { %799 = dma.done.wait [#allocation3], 256  }
  0x2f   :  { %800 = vsyncadd [#allocation3], 4294967040 }
  0x30   :  { %801 = dma.done.wait [#allocation5], 768  }
  0x31   :  { %802 = vsyncadd [#allocation5], 4294966528 }
  0x32   :  { %803 = dma.done.wait [#allocation8], 512  }
  0x33   :  { %804 = vsyncadd [#allocation8], 4294966784  ;;  %v813_v0 = vmov 0   ;;  %v680_v1 = vld [vmem:[%s991_s4 + $0xc] ss:$24 sps:$4 sm:$0xff]   ;;  %s814_s12 = smov 96   ;;  %v107_v27 = vlaneseq }
  0x34   :  { %244 = vmatprep.mubr.bf16.mxu1 %v813_v0  ;;  %203 = vmatprep.mubr.bf16.mxu0 %v813_v0  ;;  %v97_v2 = vld [vmem:[%s987_s0] sm:$0xff]  ;;  %vm167_vm0 = vcmask 130048   ;;  %v686_v9 = vld [vmem:[#allocation2 + $0x8] sm:$0xff]   ;;  %v815_v10 = vmov 0.0   ;;  %s816_s14 = smov 32   ;;  %vm817_vm1 = vmmov 0  }
  0x35   :  { %678 = vset.pattern.permute.xlu1 %v813_v0  ;;  %679 = vset.pattern.permute.xlu0 %v813_v0  ;;  %v98_v3 = vpack.c.bf16 %v97_v2, %v97_v2  ;;  %v682_v4 = vld [vmem:[%s991_s4 + $0x4] ss:$24 sps:$4 sm:$0xff]   ;;  %v684_v5 = vld [vmem:[%s991_s4 + $0x8] ss:$24 sps:$4 sm:$0xff]   ;;  %v690_v12 = vld [vmem:[%s991_s4 + $0x14] ss:$24 sps:$4 sm:$0xff]  }
  0x36   :  { %226 = vmatprep.subr.bf16.mxu1 %v680_v1  ;;  %v685_v6 = vld [vmem:[%s991_s4] ss:$24 sps:$4 sm:$0xff]   ;;  %185 = vmatprep.subr.bf16.mxu0 %v682_v4  ;;  %v688_v13 = vld [vmem:[%s991_s4 + $0x10] ss:$24 sps:$4 sm:$0xff]   ;;  %v693_v14 = vld [vmem:[#allocation4 + $0x14] ss:$8 sps:$4 sm:$0xff]  }
  0x37   :  { %v93_v7 = vld [vmem:[%s988_s1] sm:$0xff]  ;;  %376 = vrot.lane.b32.xlu0 %v98_v3, %s814_s12  ;;  %227 = vmatpush1.bf16.msra.mxu1 %v684_v5  ;;  %vm310_vm2 = vcmask 261120   ;;  %v694_v16 = vld [vmem:[#allocation6 + $0x8] sm:$0xff]   ;;  %v698_v19 = vld [vmem:[#allocation6] sm:$0xff]   ;;  %v108_v28 = vshrl.u32 %v107_v27, 7 }
  0x38   :  { %v94_v8 = vpack.c.bf16 %v93_v7, %v93_v7  ;;  %186 = vmatpush1.bf16.msra.mxu0 %v685_v6  ;;  %456 = vrot.lane.b32.xlu1 %v98_v3, %s809_s27  ;;  %v687_v11 = vld [vmem:[#allocation2] sm:$0xff]   ;;  %v697_v17 = vld [vmem:[#allocation4 + $0x4] ss:$8 sps:$4 sm:$0xff]   ;;  %v695_v18 = vld [vmem:[#allocation4] ss:$8 sps:$4 sm:$0xff]  }
  0x39   :  { %649 = vmatprep.subr.bf16.mxu1 %v815_v10  ;;  %267 = vmatprep.subr.bf16.mxu0 %v690_v12  ;;  %v691_v15 = vld [vmem:[#allocation4 + $0x10] ss:$8 sps:$4 sm:$0xff]   ;;  %v701_v20 = vld [vmem:[#allocation7 + $0x14] ss:$8 sps:$4 sm:$0xff]   ;;  %v699_v21 = vld [vmem:[#allocation7 + $0x10] ss:$8 sps:$4 sm:$0xff]  }
  0x3a   :  { %625 = vmatmul.mubr.msk.bf16.vlgmr.msra.gmra.mxu1 %vm167_vm0, %v94_v8  ;;  %v704_v22 = vld [vmem:[#allocation7 + $0x4] ss:$8 sps:$4 sm:$0xff]   ;;  %v702_v25 = vld [vmem:[#allocation7] ss:$8 sps:$4 sm:$0xff]   ;;  %v109_v29 = vsub.s32 0, %v108_v28  ;;  %v117_v51 = vsub.s32 2, %v108_v28 }
  0x3b   :  { %624 = vmatmul.mubr.msk.bf16.vlgmr.msra.gmra.mxu0 %vm167_vm0, %v94_v8  ;;  %650 = vmatpush3.bf16.msra.mxu1 %v686_v9  ;;  %v105_v30 = vld [vmem:[%s992_s5] sm:$0x3f]  ;;  %v125_v52 = vsub.s32 4, %v108_v28  ;;  %v121_v53 = vsub.s32 3, %v108_v28  ;;  %v113_v58 = vsub.s32 1, %v108_v28  ;;  %v129_v62 = vsub.s32 5, %v108_v28 }
  0x3c   :  { %522 = vrot.lane.b32.xlu0 %v98_v3, %s816_s14  ;;  %651 = vmatprep.subr.bf16.mxu1 %v815_v10  ;;  %v110_v33 = vrot.slane %v105_v30, %v109_v29  ;;  %v95_v50 = vld [vmem:[%s989_s2] sm:$0xff]  ;;  %v118_v54 = vrot.slane %v105_v30, %v117_v51 }
  0x3d   :  { %653 = vmatprep.mubr.msk.bf16.mxu1 %vm817_vm1, %v815_v10  ;;  %285 = vmatprep.mubr.bf16.mxu0 %v813_v0  ;;  %v126_v55 = vrot.slane %v105_v30, %v125_v52  ;;  %v122_v56 = vrot.slane %v105_v30, %v121_v53  ;;  %v114_v2 = vrot.slane %v105_v30, %v113_v58 }
  0x3e   :  { %268 = vmatpush1.bf16.msra.mxu0 %v688_v13  ;;  %v130_v7 = vrot.slane %v105_v30, %v129_v62 }
  0x3f   :  { %652 = vmatpush3.bf16.msra.mxu1 %v687_v11  ;;  %413 = vmatprep.subr.bf16.mxu0 %v693_v14 }
  0x40   :  { %657 = vmatprep.subr.bf16.mxu1 %v815_v10 }
  0x42   :  { %654 = vmatmul.mubr.msk.bf16.vlgmr.msra.gmra.mxu1 %vm310_vm2, %v98_v3 }
  0x43   :  { %626 = vmatmul.mubr.msk.bf16.vlgmr.msra.gmra.mxu0 %vm167_vm0, %v94_v8  ;;  %658 = vmatpush3.bf16.msra.mxu1 %v694_v16 }
  0x44   :  { %414 = vmatpush1.bf16.msra.mxu0 %v691_v15  ;;  %659 = vmatprep.subr.bf16.mxu1 %v815_v10 }
  0x45   :  { %415 = vmatprep.subr.bf16.mxu0 %v697_v17  ;;  %433 = vmatprep.mubr.bf16.mxu0 %v813_v0 }
  0x46   :  { %661 = vmatprep.mubr.msk.bf16.mxu1 %vm817_vm1, %v815_v10 }
  0x47   :  { %660 = vmatpush3.bf16.msra.mxu1 %v698_v19 }
  0x48   :  { %416 = vmatpush1.bf16.msra.mxu0 %v695_v18 }
  0x49   :  { %559 = vmatprep.subr.bf16.mxu0 %v701_v20 }
  0xa9   :  { %v377_v23 = vpop.permute.xlu0 %376 }
  0xaa   :  { %634 = vmatmul.mubr.msk.bf16.vlgmr.msra.gmra.mxu0 %vm310_vm2, %v377_v23  ;;  %v457_v24 = vpop.permute.xlu1 %456 }
  0xab   :  { %560 = vmatpush1.bf16.msra.mxu0 %v699_v21  ;;  %579 = vmatprep.mubr.bf16.mxu0 %v813_v0 }
  0xac   :  { %662 = vmatmul.mubr.msk.bf16.vlgmr.msra.gmra.mxu1 %vm310_vm2, %v457_v24  ;;  %561 = vmatprep.subr.bf16.mxu0 %v704_v22  ;;  %v96_v24 = vld [vmem:[%s990_s3] sm:$0xff] }
  0xae   :  { %v523_v26 = vpop.permute.xlu0 %522 }
  0xaf   :  { %562 = vmatpush1.bf16.msra.mxu0 %v702_v25 }
  0xb2   :  { %642 = vmatmul.mubr.msk.bf16.vlgmr.msra.gmra.mxu0 %vm310_vm2, %v523_v26 }
  0xfa   :  { %v246_v31 = vpop.f32.mrf.mxu1 }
  0xfb   :  { %v205_v32 = vpop.f32.mrf.mxu0  ;;  %v247_v57 = vadd.f32 %v246_v31, %v118_v54 }
  0xfc   :  { %v248_v34 = vpop.f32.mrf.mxu1  ;;  %v206_v38 = vadd.f32 %v205_v32, %v110_v33 }
  0xfd   :  { %v207_v35 = vpop.f32.mrf.mxu0  ;;  %v249_v61 = vadd.f32 %v248_v34, %v122_v56 }
  0xfe   :  { %v250_v36 = vpop.f32.mrf.mxu1  ;;  %v208_v12 = vadd.f32 %v207_v35, %v114_v2 }
  0xff   :  { %v209_v37 = vpop.f32.mrf.mxu0 }
 0x100   :  { %v251_v39 = vpop.f32.mrf.mxu1 }
 0x101   :  { %v210_v40 = vpop.f32.mrf.mxu0 }
 0x102   :  { %v348_v41 = vpop.f32.mrf.mxu1 }
 0x103   :  { %v287_v42 = vpop.f32.mrf.mxu0  ;;  %v944_v43 = vadd.f32 %v348_v41, %v206_v38 }
 0x104   :  { %v655_v44 = vpop.f32.mrf.mxu1  ;;  %v288_v59 = vadd.f32 %v287_v42, %v126_v55 }
 0x105   :  { %v289_v45 = vpop.f32.mrf.mxu0  ;;  %354 = vmax.xlane.f32.xlu1 %v944_v43 }
 0x106   :  { %v351_v46 = vpop.f32.mrf.mxu1  ;;  %v290_v16 = vadd.f32 %v289_v45, %v130_v7 }
 0x107   :  { %v291_v47 = vpop.f32.mrf.mxu0 }
 0x108   :  { %v656_v48 = vpop.f32.mrf.mxu1 }
 0x109   :  { %v292_v49 = vpop.f32.mrf.mxu0 }
 0x116   :  { %366 = vperm.xlu1 %678, %v95_v50  }
 0x16a   :  { %v435_v60 = vpop.f32.mrf.mxu0 }
 0x16b   :  { %v436_v63 = vadd.f32 %v435_v60, %v247_v57 }
 0x16c   :  { %v437_v0 = vpop.f32.mrf.mxu0  ;;  %v507_v1 = vpop.f32.mrf.mxu1 }
 0x16d   :  { %444 = vst [vmem:[%s998_s11] sm:$0xff] %v436_v63  ;;  %v438_v3 = vadd.f32 %v437_v0, %v249_v61  ;;  %v508_v4 = vadd.f32 %v507_v1, %v288_v59 }
 0x16e   :  { %v439_v5 = vpop.f32.mrf.mxu0  ;;  %v663_v6 = vpop.f32.mrf.mxu1 }
 0x16f   :  { %v442_v8 = vmul.f32 1.442695, %v438_v3  ;;  %v513_v9 = vmax.f32 %v508_v4, 0.0 }
 0x170   :  { %v440_v10 = vpop.f32.mrf.mxu0  ;;  %v510_v11 = vpop.f32.mrf.mxu1 }
 0x171   :  { %705 = vpow2.f32 %v442_v8  ;;  %v514_v13 = vadd.f32 1.0, %v513_v9 }
 0x172   :  { %v581_v14 = vpop.f32.mrf.mxu0  ;;  %v664_v15 = vpop.f32.mrf.mxu1 }
 0x173   :  { %516 = vst [vmem:[%s998_s11 + $0x20] sm:$0xff] %v514_v13  ;;  %v588_v17 = vadd.f32 %v581_v14, %v208_v12 }
 0x174   :  { %v583_v18 = vpop.f32.mrf.mxu0 }
 0x175   :  { %589 = vst [vmem:[%s997_s10 + $0x10] sm:$0xff] %v588_v17  ;;  %v590_v19 = vadd.f32 %v583_v18, %v290_v16 }
 0x176   :  { %v585_v20 = vpop.f32.mrf.mxu0 }
 0x177   :  { %591 = vst [vmem:[%s998_s11 + $0x30] sm:$0xff] %v590_v19  ;;  %v592_v21 = vsub.f32 0.0, %v590_v19 }
 0x178   :  { %v586_v22 = vpop.f32.mrf.mxu0 }
 0x179   :  { %v593_v23 = vmul.f32 1.442695, %v592_v21 }
 0x17b   :  { %707 = vpow2.f32 %v593_v23 }
 0x17e   :  { %v706_v25 = vpop.eup %705 }
 0x17f   :  { %445 = vst [vmem:[%s998_s11 + $0x8] sm:$0xff] %v706_v25  ;;  %v446_v26 = vmul.f32 %v706_v25, %v96_v24 }
 0x181   :  { %v447_v27 = vadd.f32 %v446_v26, %v436_v63 }
 0x183   :  { %450 = vst [vmem:[%s998_s11 + $0x10] sm:$0xff] %v447_v27  ;;  %v448_v28 = vmul.f32 1.442695, %v447_v27 }
 0x185   :  { %709 = vpow2.f32 %v448_v28 }
 0x188   :  { %v708_v29 = vpop.eup %707 }
 0x189   :  { %v595_v30 = vadd.f32 1.0, %v708_v29 }
 0x18b   :  { %711 = vrcp.f32 %v595_v30 }
 0x18e   :  { %v355_v31 = vpop.xlane.xlu1 %354 }
 0x18f   :  { %v356_v32 = vsub.f32 %v944_v43, %v355_v31 }
 0x191   :  { %v357_v34 = vmul.f32 1.442695, %v356_v32 }
 0x192   :  { %v710_v33 = vpop.eup %709  ;;  %v367_v45 = vpop.permute.xlu1 %366 }
 0x193   :  { %451 = vst [vmem:[%s998_s11 + $0x18] sm:$0xff] %v710_v33  ;;  %v515_v35 = vmul.f32 %v710_v33, %v514_v13  ;;  %713 = vpow2.f32 %v357_v34 }
 0x195   :  { %517 = vst [vmem:[%s998_s11 + $0x28] sm:$0xff] %v515_v35 }
 0x198   :  { %v712_v36 = vpop.eup %711 }
 0x199   :  { %v598_v37 = vsub.f32 1.0, %v712_v36 }
 0x19b   :  { %v599_v38 = vmul.f32 %v598_v37, %v515_v35 }
 0x19d   :  { %v600_v40 = vand.u32 2147483647, %v599_v38 }
 0x1a0   :  { %v714_v39 = vpop.eup %713 }
 0x1a1   :  { %359 = vadd.xlane.f32.xlu0 %v714_v39 }
 0x1a5   :  { %601 = vadd.xlane.f32.xlu0 %v600_v40 }
 0x22a   :  { %v360_v41 = vpop.xlane.xlu0 %359 }
 0x22b   :  { %715 = vrcp.f32 %v360_v41 }
 0x22e   :  { %v602_v42 = vpop.xlane.xlu0 %601 }
 0x22f   :  { %v603_v43 = vmax.f32 %v602_v42, 1e-12 }
 0x231   :  { %717 = vrcp.f32 %v603_v43 }
 0x238   :  { %v716_v44 = vpop.eup %715 }
 0x239   :  { %v362_v46 = vmul.f32 %v716_v44, %v714_v39 }
 0x23b   :  { %363 = vst [vmem:[%s997_s10] sm:$0xff] %v362_v46  ;;  %v369_v47 = vmul.f32 %v367_v45, %v362_v46 }
 0x23d   :  { %370 = vst [vmem:[%s997_s10 + $0x8] sm:$0xff] %v369_v47 }
 0x23e   :  { %v718_v48 = vpop.eup %717 }
 0x23f   :  { %v605_v49 = vmul.f32 %v718_v48, %v599_v38 }
 0x241   :  { %606 = vst [vmem:[%s998_s11 + $0x38] sm:$0xff] %v605_v49 }
 0x242   :  { %615 = vsyncpa [#allocation3], 1 }
 0x243   :  { %616 = vsyncpa [#allocation5], 1 }
 0x244   :  { %617 = vsyncpa [#allocation8], 1 }

</bundles_post_ra>
